<compile_context>
chip_gen: v7x
topology: tpu7x:2x2x1
jax: 0.10.0
libtpu: 0.0.40
codegen_flags: <defaults>
</compile_context>

<pallas_src>
import functools

import jax
import jax.numpy as jnp
from jax.experimental import pallas as pl
from jax.experimental.pallas import tpu as pltpu


# ----------------------------------------------------------------------------
# Pallas kernel: per-group fake quantization on a (rows, row_width) tile.
# ----------------------------------------------------------------------------
def _fake_quant_kernel(x_ref, szp_ref, o_ref, *, n_bits, qmin, qmax,
                       group_size, groups_per_row):
    f32 = jnp.float32
    row_width = groups_per_row * group_size

    # ---- per-group math on the small (rows, groups_per_row) tile ----------
    # clamp_ste(scale, 1e-4, 1e4): forward value is the clamp.  The clamp must
    # stay BEFORE the reciprocal so garbage in the ragged/OOB region stays
    # finite (those rows' writes are masked anyway).
    scale = jnp.clip(szp_ref[0].astype(f32), 0.0001, 10000.0)
    inv_scale = 1.0 / scale                      # per-group, not per-element
    zp = szp_ref[1].astype(f32)
    if n_bits == 1:
        rzp = jnp.clip(jnp.sign(zp), float(qmin), float(qmax))    # sign_ste
    else:
        rzp = jnp.clip(jnp.round(zp), float(qmin), float(qmax))   # round_ste
    # Fold the zero point into the clip bounds:
    #   clip(x_int + rzp, qmin, qmax) - rzp == clip(x_int, qmin-rzp, qmax-rzp)
    lo = float(qmin) - rzp
    hi = float(qmax) - rzp

    # ---- expand per-group values to per-element lanes ----------------------
    if groups_per_row > 1:
        k = groups_per_row
        # One-hot expansion matrix E[g, j] = 1.0 iff lane j belongs to group g.
        col = jax.lax.broadcasted_iota(jnp.int32, (k, row_width), 1)
        start = jax.lax.broadcasted_iota(jnp.int32, (k, row_width), 0) * group_size
        expand_mat = jnp.logical_and(col >= start,
                                     col < start + group_size).astype(f32)

        def expand(v):  # (rows, k) -> (rows, row_width); exact value copy
            return jnp.dot(v, expand_mat, preferred_element_type=f32,
                           precision=jax.lax.Precision.HIGHEST)

        scale_e, inv_e = expand(scale), expand(inv_scale)
        lo_e, hi_e = expand(lo), expand(hi)
    else:
        # One group per row: (rows, 1) broadcasts along lanes for free.
        scale_e, inv_e, lo_e, hi_e = scale, inv_scale, lo, hi

    # ---- element-wise fake quantization ------------------------------------
    x = x_ref[...].astype(f32)
    if n_bits == 1:
        x_int = jnp.sign(x * inv_e)              # sign_ste(x / scale)
    else:
        # TODO(synk): round(x * (1/scale)) may differ from torch's
        # round(x / scale) by one step exactly at .5 boundaries (1-ulp
        # reciprocal error); the per-element divide is avoided on purpose.
        x_int = jnp.round(x * inv_e)
    x_q = jnp.clip(x_int, lo_e, hi_e)
    o_ref[...] = (x_q * scale_e).astype(o_ref.dtype)


# ----------------------------------------------------------------------------
# Parameter init (plain JAX glue, mirrors UniformAffineQuantizer.__init__).
# ----------------------------------------------------------------------------
def init_quantizer_params(weight, n_bits, group_size):
    if group_size in (-1, None):
        group_size = weight.shape[-1]
    assert weight.shape[-1] % group_size == 0

    x = weight.reshape(-1, group_size)
    xmin = jnp.min(x, axis=-1, keepdims=True)
    xmax = jnp.max(x, axis=-1, keepdims=True)
    rng = xmax - xmin
    if n_bits == 1:
        scale = jnp.mean(jnp.abs(x), axis=-1, keepdims=True)
    else:
        scale = rng / (2 ** n_bits - 1)
    scale = jnp.clip(scale, 0.0001, 10000.0)
    if n_bits == 1:
        zero_point = -(xmin + xmax) / jnp.clip(2.0 * scale, -10000.0, 10000.0)
    else:
        zero_point = -jnp.clip(xmin / scale, -10000.0, 10000.0)
    zero_point = jnp.round(zero_point)
    return scale.astype(jnp.float32), zero_point.astype(jnp.float32), group_size


# ----------------------------------------------------------------------------
# Host-side tiling helpers.
# ----------------------------------------------------------------------------
def _cdiv(a, b):
    return -(-a // b)


def _round_up(a, m):
    return _cdiv(a, m) * m


def _choose_groups_per_row(dim2, group_size, max_row_width=2048):
    """Pack several whole groups per kernel row so blocks are lane-dense.

    Largest divisor K of (dim2 // group_size) with K*group_size <= max_row_width,
    preferring widths that are multiples of 128 lanes.
    """
    g_row = dim2 // group_size
    best = 1
    for k in range(1, g_row + 1):
        width = k * group_size
        if width > max_row_width:
            break
        if g_row % k:
            continue
        if width % 128 == 0 or (best * group_size) % 128 != 0:
            best = k
    # TODO(synk): if no lane-aligned packing exists (e.g. group_size=96 and a
    # short row) the last 128-lane tile keeps masked partial stores.
    return best


def _vmem_budget():
    """(target x-block bytes, vmem_limit_bytes) per TPU generation."""
    kind = ""
    try:
        kind = jax.devices()[0].device_kind.lower()
    except Exception:
        pass
    if "v7" in kind:
        # v7x: ~3.2 TB/s HBM but only 64 MiB physical VMEM -> ~5 MiB blocks,
        # whole double-buffered footprint (incl. temporaries) kept << 56 MiB.
        return 5 << 20, 48 << 20
    if "v6" in kind:
        # v6e: ~1.4 TB/s, 128 MiB physical VMEM -> 4 MiB blocks.
        return 4 << 20, 48 << 20
    # v5e (and older / unknown): ~0.8 TB/s; 2 MiB blocks already amortize the
    # ~0.35 us step cost.  Keep the limit explicitly above the 16 MiB default
    # scoped-VMEM or the tiling gets rejected.
    return 2 << 20, 32 << 20


def _choose_rows_per_block(nrows, row_width, groups_per_row, itemsize,
                           target_block_bytes, vmem_limit_bytes):
    """Rows per grid step (multiple of 8), sized against the real VMEM cost."""
    # Per-row VMEM cost of one grid step:
    #   x in + out blocks, double-buffered ............ 4 * row_width * itemsize
    #   (2, rows, K) scale/zp block, lane-padded to 128, double-buffered
    #   in-kernel f32 temporaries (expanded scale / 1/scale / clip bounds)
    k_padded = _round_up(max(groups_per_row, 1), 128)
    per_row = (4 * row_width * itemsize
               + 4 * k_padded * 4
               + (5 if groups_per_row > 1 else 2) * row_width * 4)

    tr = target_block_bytes // max(1, row_width * itemsize)
    tr = min(tr, (vmem_limit_bytes * 3 // 4) // max(1, per_row))
    tr = min(tr, _round_up(nrows, 8))
    tr = max(8, (tr // 8) * 8)

    # Keep >= 4 (and even) grid steps when there is enough work: v7x shards the
    # "parallel" axis across 2 TensorCores, and >= 2 steps per core keeps each
    # core's prefetch/compute overlap alive.  (Best effort after 8-rounding.)
    if nrows >= 4 * 8:
        steps = max(4, _cdiv(nrows, tr))
        if steps % 2:
            steps += 1
        tr = min(tr, max(8, _round_up(_cdiv(nrows, steps), 8)))
    return tr


# ----------------------------------------------------------------------------
# Wrapper: pack groups into lane-dense rows and launch a 1-D parallel grid.
# ----------------------------------------------------------------------------
def uniform_affine_quantizer_forward(x, scale, zero_point, *, n_bits,
                                     group_size, enable=True):
    if n_bits >= 16 or not enable:
        return x
    if n_bits == 1:
        qmin, qmax = -1, 1
    else:
        qmin, qmax = 0, 2 ** n_bits - 1

    dim1, dim2 = x.shape
    if group_size in (-1, None):
        group_size = dim2
    assert dim2 % group_size == 0, "last dim must be a multiple of group_size"
    num_groups = (dim1 * dim2) // group_size

    k = _choose_groups_per_row(dim2, group_size)
    row_width = k * group_size
    nrows = num_groups // k

    # Contiguous views only: no padding copies, no output slice.
    x2 = x.reshape(nrows, row_width)
    szp = jnp.stack([scale.reshape(nrows, k),
                     zero_point.reshape(nrows, k)],
                    axis=0).astype(jnp.float32)            # (2, nrows, k)

    itemsize = jnp.dtype(x.dtype).itemsize
    target_bytes, vmem_limit = _vmem_budget()
    tr = _choose_rows_per_block(nrows, row_width, k, itemsize,
                                target_bytes, vmem_limit)
    grid = (pl.cdiv(nrows, tr),)     # ragged last block: OOB writes are masked

    kernel = functools.partial(
        _fake_quant_kernel, n_bits=n_bits, qmin=qmin, qmax=qmax,
        group_size=group_size, groups_per_row=k)

    out = pl.pallas_call(
        kernel,
        out_shape=jax.ShapeDtypeStruct((nrows, row_width), x.dtype),
        grid=grid,
        in_specs=[
            pl.BlockSpec((tr, row_width), lambda i: (i, 0)),
            pl.BlockSpec((2, tr, k), lambda i: (0, i, 0)),
        ],
        out_specs=pl.BlockSpec((tr, row_width), lambda i: (i, 0)),
        compiler_params=pltpu.CompilerParams(
            dimension_semantics=("parallel",),
            vmem_limit_bytes=vmem_limit),
    )(x2, szp)
    return out.reshape(dim1, dim2)


# ----------------------------------------------------------------------------
# Pure-JAX reference (same forward math, no Pallas) for the sanity check.
# ----------------------------------------------------------------------------
def _reference(x, scale, zero_point, *, n_bits, group_size):
    if n_bits == 1:
        qmin, qmax = -1, 1
    else:
        qmin, qmax = 0, 2 ** n_bits - 1
    dim1, dim2 = x.shape
    xg = x.reshape(-1, group_size).astype(jnp.float32)
    s = jnp.clip(scale.astype(jnp.float32), 0.0001, 10000.0)
    inv_s = 1.0 / s
    if n_bits == 1:
        rzp = jnp.clip(jnp.sign(zero_point), qmin, qmax)
        x_int = jnp.sign(xg * inv_s)
    else:
        rzp = jnp.clip(jnp.round(zero_point), qmin, qmax)
        x_int = jnp.round(xg * inv_s)
    x_q = jnp.clip(x_int + rzp, qmin, qmax) - rzp
    return (x_q * s).astype(x.dtype).reshape(dim1, dim2)


if __name__ == "__main__":
    key = jax.random.PRNGKey(0)
    k1, k2 = jax.random.split(key)
    w_a = jax.random.normal(k1, (8, 1024), dtype=jnp.float32)
    w_b = jax.random.normal(k2, (16, 256), dtype=jnp.float32)

    def check(weight, n_bits, group_size):
        scale, zero_point, gs = init_quantizer_params(weight, n_bits, group_size)
        out = uniform_affine_quantizer_forward(
            weight, scale, zero_point, n_bits=n_bits, group_size=gs)
        out = jax.block_until_ready(out)
        ref = _reference(weight, scale, zero_point, n_bits=n_bits, group_size=gs)
        assert out.shape == weight.shape and out.dtype == weight.dtype
        err = float(jnp.max(jnp.abs(out - ref)))
        # Any real bug is >= one quantization step (~1e-2); 1e-4 is just slack.
        assert err < 1e-4, (n_bits, gs, err)

    check(w_a, n_bits=8, group_size=128)   # packed path: 8 groups / 1024 lanes
    check(w_b, n_bits=4, group_size=32)    # small-group packed path (gs < 128)
    check(w_b, n_bits=8, group_size=-1)    # one group per row (per-row quant)
    check(w_a, n_bits=1, group_size=128)   # binary (sign) path

    print("KERNEL_OK")
</pallas_src>

<mosaic_0001>
module attributes {stable_mosaic.version = 11 : i64} {
  func.func @_fake_quant_kernel(%arg0: i32, %arg1: memref<8x1024xf32, #tpu.memory_space<vmem>>, %arg2: memref<2x8x8xf32, #tpu.memory_space<vmem>>, %arg3: memref<8x1024xf32, #tpu.memory_space<vmem>>) attributes {dimension_semantics = [#tpu.dimension_semantics<parallel>], iteration_bounds = array<i64: 1>, scalar_prefetch = 0 : i64, scratch_operands = 0 : i64, tpu.core_type = #tpu.core_type<tc>, window_params = [{transform_indices = @transform_0, window_bounds = array<i64: 8, 1024>}, {transform_indices = @transform_1, window_bounds = array<i64: 2, 8, 8>}, {transform_indices = @transform_2, window_bounds = array<i64: 8, 1024>}]} {
    %c0 = arith.constant 0 : index
    %c0_0 = arith.constant 0 : index
    %c0_1 = arith.constant 0 : index
    %0 = vector.load %arg2[%c0, %c0_0, %c0_1] : memref<2x8x8xf32, #tpu.memory_space<vmem>>, vector<1x8x8xf32>
    %1 = vector.shape_cast %0 : vector<1x8x8xf32> to vector<8x8xf32>
    %cst = arith.constant 9.99999974E-5 : f32
    %cst_2 = arith.constant 1.000000e+04 : f32
    %2 = vector.broadcast %cst : f32 to vector<8x8xf32>
    %3 = arith.maximumf %2, %1 : vector<8x8xf32>
    %4 = vector.broadcast %cst_2 : f32 to vector<8x8xf32>
    %5 = arith.minimumf %4, %3 : vector<8x8xf32>
    %cst_3 = arith.constant 1.000000e+00 : f32
    %6 = vector.broadcast %cst_3 : f32 to vector<8x8xf32>
    %7 = arith.divf %6, %5 : vector<8x8xf32>
    %c1 = arith.constant 1 : index
    %c0_4 = arith.constant 0 : index
    %c0_5 = arith.constant 0 : index
    %8 = vector.load %arg2[%c1, %c0_4, %c0_5] : memref<2x8x8xf32, #tpu.memory_space<vmem>>, vector<1x8x8xf32>
    %9 = vector.shape_cast %8 : vector<1x8x8xf32> to vector<8x8xf32>
    %10 = math.roundeven %9 : vector<8x8xf32>
    %cst_6 = arith.constant 0.000000e+00 : f32
    %cst_7 = arith.constant 2.550000e+02 : f32
    %11 = vector.broadcast %cst_6 : f32 to vector<8x8xf32>
    %12 = arith.maximumf %11, %10 : vector<8x8xf32>
    %13 = vector.broadcast %cst_7 : f32 to vector<8x8xf32>
    %14 = arith.minimumf %13, %12 : vector<8x8xf32>
    %cst_8 = arith.constant 0.000000e+00 : f32
    %15 = vector.broadcast %cst_8 : f32 to vector<8x8xf32>
    %16 = arith.subf %15, %14 : vector<8x8xf32>
    %cst_9 = arith.constant 2.550000e+02 : f32
    %17 = vector.broadcast %cst_9 : f32 to vector<8x8xf32>
    %18 = arith.subf %17, %14 : vector<8x8xf32>
    %19 = tpu.iota {dimensions = array<i32: 1>} : vector<8x1024xi32>
    %20 = tpu.iota {dimensions = array<i32: 0>} : vector<8x1024xi32>
    %c128_i32 = arith.constant 128 : i32
    %21 = vector.broadcast %c128_i32 : i32 to vector<8x1024xi32>
    %22 = arith.muli %20, %21 : vector<8x1024xi32>
    %23 = arith.cmpi sge, %19, %22 : vector<8x1024xi32>
    %c128_i32_10 = arith.constant 128 : i32
    %24 = vector.broadcast %c128_i32_10 : i32 to vector<8x1024xi32>
    %25 = arith.addi %22, %24 : vector<8x1024xi32>
    %26 = arith.cmpi slt, %19, %25 : vector<8x1024xi32>
    %27 = arith.andi %23, %26 : vector<8x1024xi1>
    %28 = arith.extui %27 : vector<8x1024xi1> to vector<8x1024xi32>
    %29 = arith.sitofp %28 : vector<8x1024xi32> to vector<8x1024xf32>
    %cst_11 = arith.constant dense<0.000000e+00> : vector<8x1024xf32>
    %30 = tpu.matmul %5, %29, %cst_11 {dimension_numbers = #tpu.dot_dimension_numbers<[1], [0], [0], [1], [0, 0, 1, 1], [], []>, precision = #tpu.contract_precision<fp32>} : vector<8x8xf32>, vector<8x1024xf32>, vector<8x1024xf32> -> vector<8x1024xf32>
    %cst_12 = arith.constant dense<0.000000e+00> : vector<8x1024xf32>
    %31 = tpu.matmul %7, %29, %cst_12 {dimension_numbers = #tpu.dot_dimension_numbers<[1], [0], [0], [1], [0, 0, 1, 1], [], []>, precision = #tpu.contract_precision<fp32>} : vector<8x8xf32>, vector<8x1024xf32>, vector<8x1024xf32> -> vector<8x1024xf32>
    %cst_13 = arith.constant dense<0.000000e+00> : vector<8x1024xf32>
    %32 = tpu.matmul %16, %29, %cst_13 {dimension_numbers = #tpu.dot_dimension_numbers<[1], [0], [0], [1], [0, 0, 1, 1], [], []>, precision = #tpu.contract_precision<fp32>} : vector<8x8xf32>, vector<8x1024xf32>, vector<8x1024xf32> -> vector<8x1024xf32>
    %cst_14 = arith.constant dense<0.000000e+00> : vector<8x1024xf32>
    %33 = tpu.matmul %18, %29, %cst_14 {dimension_numbers = #tpu.dot_dimension_numbers<[1], [0], [0], [1], [0, 0, 1, 1], [], []>, precision = #tpu.contract_precision<fp32>} : vector<8x8xf32>, vector<8x1024xf32>, vector<8x1024xf32> -> vector<8x1024xf32>
    %c0_15 = arith.constant 0 : index
    %c0_16 = arith.constant 0 : index
    %34 = vector.load %arg1[%c0_15, %c0_16] : memref<8x1024xf32, #tpu.memory_space<vmem>>, vector<8x1024xf32>
    %35 = arith.mulf %34, %31 : vector<8x1024xf32>
    %36 = math.roundeven %35 : vector<8x1024xf32>
    %37 = arith.maximumf %32, %36 : vector<8x1024xf32>
    %38 = arith.minimumf %33, %37 : vector<8x1024xf32>
    %39 = arith.mulf %38, %30 : vector<8x1024xf32>
    %c0_17 = arith.constant 0 : index
    %c0_18 = arith.constant 0 : index
    %40 = vector.load %arg3[%c0_17, %c0_18] : memref<8x1024xf32, #tpu.memory_space<vmem>>, vector<8x1024xf32>
    tpu.vector_store %arg3[%c0_17, %c0_18], %39 {strides = array<i32>} : memref<8x1024xf32, #tpu.memory_space<vmem>>, vector<8x1024xf32>,
    return
  }
  func.func @transform_0(%arg0: i32) -> (i32, i32) {
    %c0_i32 = arith.constant 0 : i32
    %c0_i32_0 = arith.constant 0 : i32
    return %arg0, %c0_i32 : i32, i32
  }
  func.func @transform_1(%arg0: i32) -> (i32, i32, i32) {
    %c0_i32 = arith.constant 0 : i32
    %c0_i32_0 = arith.constant 0 : i32
    %c0_i32_1 = arith.constant 0 : i32
    return %c0_i32, %arg0, %c0_i32_0 : i32, i32, i32
  }
  func.func @transform_2(%arg0: i32) -> (i32, i32) {
    %c0_i32 = arith.constant 0 : i32
    %c0_i32_0 = arith.constant 0 : i32
    return %arg0, %c0_i32 : i32, i32
  }
}

</mosaic_0001>

<bundles_post_ra>
// kernel: tpu_custom_call.1
= control target key start
LH: loop header
LB: loop body
LE: loop exit
PB: predicated region body
PF: predicated region fallthrough
CT: control target
= control target key end

     0   :  { %7 = vsyncpa [#allocation3], 0  ;;  %s8852_s0 = inlined_call_operand.hbm [shape: f32[8,1024], index: 0, kind: input, shape index: {}]   ;;  %s8853_s1 = inlined_call_operand.hbm [shape: f32[2,8,8], index: 1, kind: input, shape index: {}]   ;;  %s8854_s2 = inlined_call_operand.hbm [shape: f32[8,1024], index: 2, kind: output, shape index: {}]  }
   0x1   :  { %8 = vsyncpa [#allocation6], 0 }
   0x2   :  { %9 = vsyncpa [#allocation4], 0  ;;  %s7982_s9 = smov [#allocation2]   ;;  %s7983_s11 = smov [#allocation5]  }
   0x3   :  { %s16_s10 = sshll.u32 %s7982_s9, 4  ;;  %s25_s12 = sshll.u32 %s7983_s11, 4  ;;  %s17_s10 = int_to_ptr.vmem [resolvable:$true] %s16_s10  ;;  %s8004_s12 = int_to_ptr.vmem [resolvable:$true] %s25_s12 }
   0x4   :  { %s7910_s15 = scalar_lea.hbm %s8852_s0, 1024 }
   0x5   :  { %p7911_p0 = scmp.ne.s32.totalorder %s8852_s0, %s7910_s15  ;;  %p7914_p1 = scmp.lt.u32.totalorder %s7910_s15, %s8852_s0 }
   0x7   :  { %p7916_p2 = pnand %p7914_p1, %p7911_p0 }
   0x9   :  { %7919 = shalt.err (!%p7916_p2)
}
   0xa   :  { %s7920_s20 = scalar_lea.vmem %s17_s10, 1024  ;;  %p7925_p4 = scmp.lt.s32.totalorder %s17_s10, %s17_s10 }
   0xb   :  { %p7921_p3 = scmp.ne.s32.totalorder %s17_s10, %s7920_s20  ;;  %p7926_p5 = scmp.lt.s32.totalorder %s7920_s20, %s7920_s20 }
   0xd   :  { %p7927_p6 = por %p7926_p5, %p7925_p4 }
   0xf   :  { %p7928_p7 = pnand %p7927_p6, %p7921_p3 }
  0x11   :  { %7931 = shalt.err (!%p7928_p7)
}
  0x12   :  { %19 = dma.hbm_to_vmem [thread:$0]  %s8852_s0, 1024, %s17_s10, [#allocation3]  }
  0x13   :  { %s7932_s25 = scalar_lea.hbm %s8853_s1, 256 }
  0x14   :  { %p7933_p8 = scmp.ne.s32.totalorder %s8853_s1, %s7932_s25  ;;  %p7936_p9 = scmp.lt.u32.totalorder %s7932_s25, %s8853_s1 }
  0x16   :  { %p7938_p10 = pnand %p7936_p9, %p7933_p8 }
  0x18   :  { %7941 = shalt.err (!%p7938_p10)
}
  0x19   :  { %s7942_s30 = scalar_lea.vmem %s8004_s12, 256  ;;  %p7947_p12 = scmp.lt.s32.totalorder %s8004_s12, %s8004_s12 }
  0x1a   :  { %p7943_p11 = scmp.ne.s32.totalorder %s8004_s12, %s7942_s30  ;;  %p7948_p13 = scmp.lt.s32.totalorder %s7942_s30, %s7942_s30 }
  0x1c   :  { %p7949_p0 = por %p7948_p13, %p7947_p12 }
  0x1e   :  { %p7950_p1 = pnand %p7949_p0, %p7943_p11 }
  0x20   :  { %7953 = shalt.err (!%p7950_p1)
}
  0x21   :  { %s7984_s0 = smov 128   ;;  %s7985_s3 = smov 8  }
  0x22   :  { %31 = dma.hbm_to_vmem [thread:$0]  %s8853_s1, 256, %s8004_s12, [#allocation6], %s7984_s0, %s7984_s0, %s7985_s3  }
  0x23   :  { %7976 = dma.done.wait [#allocation3], 1024  }
  0x24   :  { %7977 = vsyncadd [#allocation3], 4294966272 }
  0x25   :  { %7978 = dma.done.wait [#allocation6], 256  }
  0x26   :  { %7979 = vsyncadd [#allocation6], 4294967040  ;;  %v50_v0 = vlaneseq  ;;  %v7986_v1 = vmov 0.0   ;;  %v38_v9 = vld [vmem:[#allocation5] sm:$0xff]  ;;  %v7987_v12 = vmov 1.0   ;;  %vm8855_vm10 = vcmask 64512  }
  0x27   :  { %173 = vmatprep.mubr.f32.mxu0 %v7986_v1  ;;  %638 = vmatprep.mubr.f32.mxu1 %v7986_v1  ;;  %v39_v11 = vmax.f32 %v38_v9, 0.0001  ;;  %s7988_s1 = smov [#allocation7]  }
  0x28   :  { %v8037_v2 = vand.u32 127, %v50_v0  ;;  %v60_v3 = vshrl.u32 %v50_v0, 7  ;;  %s7618_s6 = sshll.u32 %s7988_s1, 4  ;;  %s7619_s6 = int_to_ptr.vmem [resolvable:$true] %s7618_s6 }
  0x29   :  { %v8083_v18 = vmin.f32 %v39_v11, 10000.0  ;;  %s7954_s7 = scalar_lea.vmem %s7619_s6, 1024  ;;  %p7959_p3 = scmp.lt.s32.totalorder %s7619_s6, %s7619_s6 }
  0x2a   :  { %v52_v4 = vadd.s32 128, %v8037_v2  ;;  %v8040_v5 = vmul.u32 128, %v60_v3  ;;  %v54_v6 = vadd.s32 384, %v8037_v2  ;;  %v53_v7 = vadd.s32 256, %v8037_v2  ;;  %p7955_p2 = scmp.ne.s32.totalorder %s7619_s6, %s7954_s7  ;;  %p7960_p4 = scmp.lt.s32.totalorder %s7954_s7, %s7954_s7 }
  0x2b   :  { %v105_v23 = vsel %vm8855_vm10, %v8083_v18, 0  ;;  %v56_v43 = vadd.s32 640, %v8037_v2  ;;  %v58_v44 = vadd.s32 896, %v8037_v2  ;;  %v55_v45 = vadd.s32 512, %v8037_v2 }
  0x2c   :  { %vm63_vm0 = vcmp.ge.s32.totalorder %v52_v4, %v8040_v5  ;;  %v8046_v8 = vadd.s32 128, %v8040_v5  ;;  %vm65_vm1 = vcmp.ge.s32.totalorder %v54_v6, %v8040_v5  ;;  %vm62_vm4 = vcmp.ge.s32.totalorder %v8037_v2, %v8040_v5  ;;  %p7961_p5 = por %p7960_p4, %p7959_p3 }
  0x2d   :  { %vm64_vm7 = vcmp.ge.s32.totalorder %v53_v7, %v8040_v5  ;;  %v8110_v26 = vand.u32 4294901760, %v105_v23  ;;  %v57_v46 = vadd.s32 768, %v8037_v2  ;;  %vm67_vm13 = vcmp.ge.s32.totalorder %v56_v43, %v8040_v5 }
  0x2e   :  { %vm72_vm2 = vcmp.lt.s32.totalorder %v52_v4, %v8046_v8  ;;  %vm74_vm3 = vcmp.lt.s32.totalorder %v54_v6, %v8046_v8  ;;  %vm71_vm5 = vcmp.lt.s32.totalorder %v8037_v2, %v8046_v8  ;;  %vm73_vm8 = vcmp.lt.s32.totalorder %v53_v7, %v8046_v8  ;;  %p7962_p6 = pnand %p7961_p5, %p7955_p2 }
  0x2f   :  { %vm8055_vm6 = vmand %vm63_vm0, %vm72_vm2  ;;  %v8125_v32 = vsub.f32 %v105_v23, %v8110_v26  ;;  %vm76_vm14 = vcmp.lt.s32.totalorder %v56_v43, %v8046_v8  ;;  %vm69_vm15 = vcmp.ge.s32.totalorder %v58_v44, %v8040_v5  ;;  %vm78_vm0 = vcmp.lt.s32.totalorder %v58_v44, %v8046_v8  ;;  %v44_v23 = vld [vmem:[#allocation5 + $0x8] sm:$0xff] }
  0x30   :  { %7636 = vmatprep.subr.msk.mxu0 %vm8055_vm6, %v7987_v12  ;;  %vm8064_vm9 = vmand %vm65_vm1, %vm74_vm3  ;;  %v7629_v14 = vsel %vm8055_vm6, 1.0, %v7986_v1  ;;  %vm66_vm1 = vcmp.ge.s32.totalorder %v55_v45, %v8040_v5  ;;  %vm75_vm2 = vcmp.lt.s32.totalorder %v55_v45, %v8046_v8  ;;  %7908 = vrcp.f32 %v8083_v18 }
  0x31   :  { %7642 = vmatprep.subr.msk.mxu1 %vm8064_vm9, %v7987_v12  ;;  %vm8074_vm11 = vmand %vm62_vm4, %vm71_vm5  ;;  %v8078_v16 = vsub.f32 %v7629_v14, %v7629_v14  ;;  %v7631_v17 = vsel %vm8064_vm9, 1.0, %v7986_v1  ;;  %v8137_v37 = vand.u32 4294901760, %v8125_v32  ;;  %vm68_vm4 = vcmp.ge.s32.totalorder %v57_v46, %v8040_v5 }
  0x32   :  { %7637 = vmatpush1.msk.msra.mxu0 %vm8074_vm11, %v7987_v12  ;;  %vm8088_vm12 = vmand %vm64_vm7, %vm73_vm8  ;;  %v8092_v20 = vsub.f32 %v7631_v17, %v7631_v17  ;;  %v7628_v21 = vsel %vm8074_vm11, 1.0, %v7986_v1  ;;  %vm77_vm5 = vcmp.lt.s32.totalorder %v57_v46, %v8046_v8 }
  0x33   :  { %7643 = vmatpush1.msk.msra.mxu1 %vm8088_vm12, %v7987_v12  ;;  %v8101_v22 = vand.u32 4294901760, %v8078_v16  ;;  %v8105_v24 = vsub.f32 %v7628_v21, %v7628_v21  ;;  %v7630_v27 = vsel %vm8088_vm12, 1.0, %v7986_v1  ;;  %v177_v39 = vsub.f32 %v8125_v32, %v8137_v37  ;;  %vm8193_vm3 = vmand %vm67_vm13, %vm76_vm14 }
  0x34   :  { %v8108_v25 = vand.u32 4294901760, %v8092_v20  ;;  %v8120_v30 = vsub.f32 %v7630_v27, %v7630_v27  ;;  %vm8199_vm7 = vmand %vm69_vm15, %vm78_vm0  ;;  %v7633_v51 = vsel %vm8193_vm3, 1.0, %v7986_v1  ;;  %vm8872_vm13 = vcmask 64512  }
  0x35   :  { %v188_v28 = vsub.f32 %v8078_v16, %v8101_v22  ;;  %v8118_v29 = vand.u32 4294901760, %v8105_v24  ;;  %v8149_v42 = vand.u32 4294901760, %v177_v39  ;;  %vm8203_vm8 = vmand %vm66_vm1, %vm75_vm2  ;;  %v7635_v52 = vsel %vm8199_vm7, 1.0, %v7986_v1 }
  0x36   :  { %v653_v31 = vsub.f32 %v8092_v20, %v8108_v25  ;;  %v8132_v35 = vand.u32 4294901760, %v8120_v30  ;;  %vm8207_vm10 = vmand %vm68_vm4, %vm77_vm5  ;;  %v8225_v53 = vsub.f32 %v7633_v51, %v7633_v51  ;;  %v7632_v54 = vsel %vm8203_vm8, 1.0, %v7986_v1 }
  0x37   :  { %v8127_v33 = vand.u32 4294901760, %v188_v28  ;;  %v194_v34 = vsub.f32 %v8105_v24, %v8118_v29  ;;  %179 = vmatmul.mubr.f32.vlgmr.msra.gmra.mrb[0].mxu0 %v8149_v42  ;;  %644 = vmatmul.mubr.f32.vlgmr.msra.gmra.mrb[0].mxu1 %v8149_v42  ;;  %v7634_v55 = vsel %vm8207_vm10, 1.0, %v7986_v1  ;;  %v8237_v56 = vsub.f32 %v7635_v52, %v7635_v52  ;;  %vm8873_vm14 = vmmov %vm8872_vm13 }
  0x38   :  { %v8134_v36 = vand.u32 4294901760, %v653_v31  ;;  %v659_v38 = vsub.f32 %v8120_v30, %v8132_v35  ;;  %259 = vmatprep.mubr.f32.mxu0 %v7986_v1  ;;  %724 = vmatprep.mubr.f32.mxu1 %v7986_v1  ;;  %v8239_v57 = vsub.f32 %v7632_v54, %v7632_v54  ;;  %v8241_v58 = vsub.f32 %v7634_v55, %v7634_v55  ;;  %vm8874_vm15 = vmmov %vm8872_vm13 }
  0x39   :  { %190 = vmatprep.subr.mxu0 %v8127_v33  ;;  %v8145_v40 = vand.u32 4294901760, %v194_v34  ;;  %v8244_v59 = vand.u32 4294901760, %v8225_v53  ;;  %v8247_v60 = vand.u32 4294901760, %v8237_v56 }
  0x3a   :  { %655 = vmatprep.subr.mxu1 %v8134_v36  ;;  %v8147_v41 = vand.u32 4294901760, %v659_v38  ;;  %v8258_v61 = vand.u32 4294901760, %v8239_v57  ;;  %v8261_v62 = vand.u32 4294901760, %v8241_v58  ;;  %v7909_v8 = vpop.eup %7908 }
  0x3b   :  { %196 = vmatpush1.msra.mxu0 %v8145_v40  ;;  %v1118_v63 = vsub.f32 %v8225_v53, %v8244_v59  ;;  %v1583_v0 = vsub.f32 %v8237_v56, %v8247_v60  ;;  %v1968_v9 = vsel %vm8872_vm13, %v7909_v8, 0  ;;  %v7563_v8 = vld [vmem:[#allocation2 + $0x38] sm:$0xff] }
  0x3c   :  { %661 = vmatpush1.msra.mxu1 %v8147_v41  ;;  %269 = vmatprep.subr.mxu0 %v8078_v16  ;;  %v1124_v2 = vsub.f32 %v8239_v57, %v8258_v61  ;;  %v1589_v3 = vsub.f32 %v8241_v58, %v8261_v62  ;;  %v8335_v11 = vand.u32 4294901760, %v1968_v9 }
  0x3d   :  { %734 = vmatprep.subr.mxu1 %v8092_v20  ;;  %v8279_v4 = vand.u32 4294901760, %v1118_v63  ;;  %v8281_v5 = vand.u32 4294901760, %v1583_v0 }
  0x3e   :  { %v8291_v6 = vand.u32 4294901760, %v1124_v2  ;;  %v8293_v7 = vand.u32 4294901760, %v1589_v3  ;;  %v8348_v14 = vsub.f32 %v1968_v9, %v8335_v11 }
  0x3f   :  { %261 = vmatmul.mubr.f32.vlgmr.msra.gmra.mrb[0].mxu0 %v8110_v26  ;;  %726 = vmatmul.mubr.f32.vlgmr.msra.gmra.mrb[0].mxu1 %v8110_v26 }
  0x40   :  { %272 = vmatpush1.msra.mxu0 %v8105_v24  ;;  %737 = vmatpush1.msra.mxu1 %v8120_v30  ;;  %v8353_v17 = vand.u32 4294901760, %v8348_v14 }
  0x41   :  { %335 = vmatprep.mubr.f32.mxu0 %v7986_v1  ;;  %7638 = vmatprep.subr.msk.mxu0 %vm8055_vm6, %v7987_v12 }
  0x42   :  { %800 = vmatprep.mubr.f32.mxu1 %v7986_v1  ;;  %7644 = vmatprep.subr.msk.mxu1 %vm8064_vm9, %v7987_v12  ;;  %v2040_v18 = vsub.f32 %v8348_v14, %v8353_v17 }
  0x44   :  { %v2041_v21 = vand.u32 4294901760, %v2040_v18 }
  0x47   :  { %338 = vmatmul.mubr.f32.vlgmr.msra.gmra.mrb[0].mxu0 %v8125_v32  ;;  %803 = vmatmul.mubr.f32.vlgmr.msra.gmra.mrb[0].mxu1 %v8125_v32 }
  0x48   :  { %7639 = vmatpush1.msk.msra.mxu0 %vm8074_vm11, %v7987_v12  ;;  %7645 = vmatpush1.msk.msra.mxu1 %vm8088_vm12, %v7987_v12 }
  0x49   :  { %410 = vmatprep.mubr.f32.mxu0 %v7986_v1  ;;  %423 = vmatprep.subr.mxu0 %v8101_v22 }
  0x4a   :  { %875 = vmatprep.mubr.f32.mxu1 %v7986_v1  ;;  %888 = vmatprep.subr.mxu1 %v8108_v25 }
  0x4f   :  { %414 = vmatmul.mubr.f32.vlgmr.msra.gmra.mrb[0].mxu0 %v8137_v37  ;;  %879 = vmatmul.mubr.f32.vlgmr.msra.gmra.mrb[0].mxu1 %v8137_v37 }
  0x50   :  { %427 = vmatpush1.msra.mxu0 %v8118_v29  ;;  %892 = vmatpush1.msra.mxu1 %v8132_v35 }
  0x51   :  { %490 = vmatprep.mubr.f32.mxu0 %v7986_v1  ;;  %7640 = vmatprep.subr.msk.mxu0 %vm8055_vm6, %v7987_v12 }
  0x52   :  { %955 = vmatprep.mubr.f32.mxu1 %v7986_v1  ;;  %7646 = vmatprep.subr.msk.mxu1 %vm8064_vm9, %v7987_v12 }
  0x57   :  { %492 = vmatmul.mubr.f32.vlgmr.msra.gmra.mrb[0].mxu0 %v8110_v26  ;;  %957 = vmatmul.mubr.f32.vlgmr.msra.gmra.mrb[0].mxu1 %v8110_v26 }
  0x58   :  { %7641 = vmatpush1.msk.msra.mxu0 %vm8074_vm11, %v7987_v12  ;;  %7647 = vmatpush1.msk.msra.mxu1 %vm8088_vm12, %v7987_v12 }
  0x59   :  { %564 = vmatprep.mubr.f32.mxu0 %v7986_v1  ;;  %1029 = vmatprep.mubr.f32.mxu1 %v7986_v1 }
  0x5a   :  { %7648 = vmatprep.subr.msk.mxu0 %vm8193_vm3, %v7987_v12  ;;  %7654 = vmatprep.subr.msk.mxu1 %vm8199_vm7, %v7987_v12 }
  0x5f   :  { %566 = vmatmul.mubr.f32.vlgmr.msra.gmra.mrb[0].mxu0 %v8110_v26  ;;  %1031 = vmatmul.mubr.f32.vlgmr.msra.gmra.mrb[0].mxu1 %v8110_v26 }
  0x60   :  { %7649 = vmatpush1.msk.msra.mxu0 %vm8203_vm8, %v7987_v12  ;;  %7655 = vmatpush1.msk.msra.mxu1 %vm8207_vm10, %v7987_v12 }
  0x61   :  { %1103 = vmatprep.mubr.f32.mxu0 %v7986_v1  ;;  %1120 = vmatprep.subr.mxu0 %v8279_v4 }
  0x62   :  { %1568 = vmatprep.mubr.f32.mxu1 %v7986_v1  ;;  %1585 = vmatprep.subr.mxu1 %v8281_v5 }
  0x63   :  { %1109 = vmatmul.mubr.f32.vlgmr.msra.gmra.mrb[2].mxu0 %v8149_v42  ;;  %1574 = vmatmul.mubr.f32.vlgmr.msra.gmra.mrb[2].mxu1 %v8149_v42 }
  0x64   :  { %1126 = vmatpush1.msra.mxu0 %v8291_v6  ;;  %1591 = vmatpush1.msra.mxu1 %v8293_v7 }
  0x65   :  { %1189 = vmatprep.mubr.f32.mxu0 %v7986_v1  ;;  %1199 = vmatprep.subr.mxu0 %v8225_v53 }
  0x66   :  { %1654 = vmatprep.mubr.f32.mxu1 %v7986_v1  ;;  %1664 = vmatprep.subr.mxu1 %v8237_v56 }
  0x6b   :  { %1191 = vmatmul.mubr.f32.vlgmr.msra.gmra.mrb[2].mxu0 %v8110_v26  ;;  %1656 = vmatmul.mubr.f32.vlgmr.msra.gmra.mrb[2].mxu1 %v8110_v26 }
  0x6c   :  { %1202 = vmatpush1.msra.mxu0 %v8239_v57  ;;  %1667 = vmatpush1.msra.mxu1 %v8241_v58 }
  0x6d   :  { %1265 = vmatprep.mubr.f32.mxu0 %v7986_v1  ;;  %7650 = vmatprep.subr.msk.mxu0 %vm8193_vm3, %v7987_v12 }
  0x6e   :  { %1730 = vmatprep.mubr.f32.mxu1 %v7986_v1  ;;  %7656 = vmatprep.subr.msk.mxu1 %vm8199_vm7, %v7987_v12 }
  0x73   :  { %1268 = vmatmul.mubr.f32.vlgmr.msra.gmra.mrb[2].mxu0 %v8125_v32  ;;  %1733 = vmatmul.mubr.f32.vlgmr.msra.gmra.mrb[2].mxu1 %v8125_v32 }
  0x74   :  { %7651 = vmatpush1.msk.msra.mxu0 %vm8203_vm8, %v7987_v12  ;;  %7657 = vmatpush1.msk.msra.mxu1 %vm8207_vm10, %v7987_v12 }
  0x75   :  { %1340 = vmatprep.mubr.f32.mxu0 %v7986_v1  ;;  %1353 = vmatprep.subr.mxu0 %v8244_v59 }
  0x76   :  { %1805 = vmatprep.mubr.f32.mxu1 %v7986_v1  ;;  %1818 = vmatprep.subr.mxu1 %v8247_v60 }
  0x7b   :  { %1344 = vmatmul.mubr.f32.vlgmr.msra.gmra.mrb[2].mxu0 %v8137_v37  ;;  %1809 = vmatmul.mubr.f32.vlgmr.msra.gmra.mrb[2].mxu1 %v8137_v37 }
  0x7c   :  { %1357 = vmatpush1.msra.mxu0 %v8258_v61  ;;  %1822 = vmatpush1.msra.mxu1 %v8261_v62 }
  0x7d   :  { %1420 = vmatprep.mubr.f32.mxu0 %v7986_v1  ;;  %7652 = vmatprep.subr.msk.mxu0 %vm8193_vm3, %v7987_v12 }
  0x7e   :  { %1885 = vmatprep.mubr.f32.mxu1 %v7986_v1  ;;  %7658 = vmatprep.subr.msk.mxu1 %vm8199_vm7, %v7987_v12 }
  0x83   :  { %1422 = vmatmul.mubr.f32.vlgmr.msra.gmra.mrb[2].mxu0 %v8110_v26  ;;  %1887 = vmatmul.mubr.f32.vlgmr.msra.gmra.mrb[2].mxu1 %v8110_v26 }
  0x84   :  { %7653 = vmatpush1.msk.msra.mxu0 %vm8203_vm8, %v7987_v12  ;;  %7659 = vmatpush1.msk.msra.mxu1 %vm8207_vm10, %v7987_v12 }
  0x85   :  { %1494 = vmatprep.mubr.f32.mxu0 %v7986_v1  ;;  %1959 = vmatprep.mubr.f32.mxu1 %v7986_v1 }
  0x86   :  { %7660 = vmatprep.subr.msk.mxu0 %vm8055_vm6, %v7987_v12  ;;  %7666 = vmatprep.subr.msk.mxu1 %vm8064_vm9, %v7987_v12 }
  0x8b   :  { %1496 = vmatmul.mubr.f32.vlgmr.msra.gmra.mrb[2].mxu0 %v8110_v26  ;;  %1961 = vmatmul.mubr.f32.vlgmr.msra.gmra.mrb[2].mxu1 %v8110_v26  ;;  %v7892_v26 = vround.rtne.f32 %v44_v23 }
  0x8c   :  { %7661 = vmatpush1.msk.msra.mxu0 %vm8074_vm11, %v7987_v12  ;;  %7667 = vmatpush1.msk.msra.mxu1 %vm8088_vm12, %v7987_v12 }
  0x8d   :  { %2036 = vmatprep.mubr.f32.mxu0 %v7986_v1  ;;  %2053 = vmatprep.subr.mxu0 %v8127_v33  ;;  %v8463_v27 = vmax.f32 %v7892_v26, 0.0 }
  0x8e   :  { %2501 = vmatprep.mubr.f32.mxu1 %v7986_v1  ;;  %2518 = vmatprep.subr.mxu1 %v8134_v36 }
  0x8f   :  { %2042 = vmatmul.mubr.f32.vlgmr.msra.gmra.mrb[4].mxu0 %v2041_v21  ;;  %2507 = vmatmul.mubr.f32.vlgmr.msra.gmra.mrb[4].mxu1 %v2041_v21  ;;  %v47_v28 = vmin.f32 %v8463_v27, 255.0 }
  0x90   :  { %2059 = vmatpush1.msra.mxu0 %v8145_v40  ;;  %2524 = vmatpush1.msra.mxu1 %v8147_v41 }
  0x91   :  { %2122 = vmatprep.mubr.f32.mxu0 %v7986_v1  ;;  %2132 = vmatprep.subr.mxu0 %v8078_v16  ;;  %v48_v31 = vsub.f32 0.0, %v47_v28  ;;  %v49_v43 = vsub.f32 255.0, %v47_v28 }
  0x92   :  { %2587 = vmatprep.mubr.f32.mxu1 %v7986_v1  ;;  %2597 = vmatprep.subr.mxu1 %v8092_v20 }
  0x93   :  { %v3831_v32 = vsel %vm8873_vm14, %v48_v31, 0  ;;  %v5694_v44 = vsel %vm8874_vm15, %v49_v43, 0 }
  0x94   :  { %v8491_v34 = vand.u32 4294901760, %v3831_v32  ;;  %v8644_v45 = vand.u32 4294901760, %v5694_v44 }
  0x96   :  { %v8504_v37 = vsub.f32 %v3831_v32, %v8491_v34  ;;  %v8657_v46 = vsub.f32 %v5694_v44, %v8644_v45 }
  0x97   :  { %2124 = vmatmul.mubr.f32.vlgmr.msra.gmra.mrb[4].mxu0 %v8335_v11  ;;  %2589 = vmatmul.mubr.f32.vlgmr.msra.gmra.mrb[4].mxu1 %v8335_v11 }
  0x98   :  { %2135 = vmatpush1.msra.mxu0 %v8105_v24  ;;  %2600 = vmatpush1.msra.mxu1 %v8120_v30  ;;  %v8509_v38 = vand.u32 4294901760, %v8504_v37  ;;  %v8670_v63 = vand.u32 4294901760, %v8657_v46 }
  0x99   :  { %2198 = vmatprep.mubr.f32.mxu0 %v7986_v1  ;;  %7662 = vmatprep.subr.msk.mxu0 %vm8055_vm6, %v7987_v12 }
  0x9a   :  { %2663 = vmatprep.mubr.f32.mxu1 %v7986_v1  ;;  %7668 = vmatprep.subr.msk.mxu1 %vm8064_vm9, %v7987_v12  ;;  %v3903_v39 = vsub.f32 %v8504_v37, %v8509_v38  ;;  %v5766_v0 = vsub.f32 %v8657_v46, %v8670_v63 }
  0x9c   :  { %v3904_v42 = vand.u32 4294901760, %v3903_v39  ;;  %v5767_v2 = vand.u32 4294901760, %v5766_v0 }
  0x9f   :  { %2201 = vmatmul.mubr.f32.vlgmr.msra.gmra.mrb[4].mxu0 %v8348_v14  ;;  %2666 = vmatmul.mubr.f32.vlgmr.msra.gmra.mrb[4].mxu1 %v8348_v14 }
  0xa0   :  { %7663 = vmatpush1.msk.msra.mxu0 %vm8074_vm11, %v7987_v12  ;;  %7669 = vmatpush1.msk.msra.mxu1 %vm8088_vm12, %v7987_v12 }
  0xa1   :  { %2273 = vmatprep.mubr.f32.mxu0 %v7986_v1  ;;  %2286 = vmatprep.subr.mxu0 %v8101_v22 }
  0xa2   :  { %2738 = vmatprep.mubr.f32.mxu1 %v7986_v1  ;;  %2751 = vmatprep.subr.mxu1 %v8108_v25 }
  0xa7   :  { %2277 = vmatmul.mubr.f32.vlgmr.msra.gmra.mrb[4].mxu0 %v8353_v17  ;;  %2742 = vmatmul.mubr.f32.vlgmr.msra.gmra.mrb[4].mxu1 %v8353_v17 }
  0xa8   :  { %2290 = vmatpush1.msra.mxu0 %v8118_v29  ;;  %2755 = vmatpush1.msra.mxu1 %v8132_v35 }
  0xa9   :  { %2353 = vmatprep.mubr.f32.mxu0 %v7986_v1  ;;  %7664 = vmatprep.subr.msk.mxu0 %vm8055_vm6, %v7987_v12 }
  0xaa   :  { %2818 = vmatprep.mubr.f32.mxu1 %v7986_v1  ;;  %7670 = vmatprep.subr.msk.mxu1 %vm8064_vm9, %v7987_v12 }
  0xaf   :  { %2355 = vmatmul.mubr.f32.vlgmr.msra.gmra.mrb[4].mxu0 %v8335_v11  ;;  %2820 = vmatmul.mubr.f32.vlgmr.msra.gmra.mrb[4].mxu1 %v8335_v11 }
  0xb0   :  { %7665 = vmatpush1.msk.msra.mxu0 %vm8074_vm11, %v7987_v12  ;;  %7671 = vmatpush1.msk.msra.mxu1 %vm8088_vm12, %v7987_v12 }
  0xb1   :  { %2427 = vmatprep.mubr.f32.mxu0 %v7986_v1  ;;  %2892 = vmatprep.mubr.f32.mxu1 %v7986_v1 }
  0xb2   :  { %7672 = vmatprep.subr.msk.mxu0 %vm8193_vm3, %v7987_v12  ;;  %7678 = vmatprep.subr.msk.mxu1 %vm8199_vm7, %v7987_v12 }
  0xb7   :  { %2429 = vmatmul.mubr.f32.vlgmr.msra.gmra.mrb[4].mxu0 %v8335_v11  ;;  %2894 = vmatmul.mubr.f32.vlgmr.msra.gmra.mrb[4].mxu1 %v8335_v11 }
  0xb8   :  { %7673 = vmatpush1.msk.msra.mxu0 %vm8203_vm8, %v7987_v12  ;;  %7679 = vmatpush1.msk.msra.mxu1 %vm8207_vm10, %v7987_v12 }
  0xb9   :  { %2966 = vmatprep.mubr.f32.mxu0 %v7986_v1  ;;  %2983 = vmatprep.subr.mxu0 %v8279_v4 }
  0xba   :  { %3431 = vmatprep.mubr.f32.mxu1 %v7986_v1  ;;  %3448 = vmatprep.subr.mxu1 %v8281_v5 }
  0xbb   :  { %2972 = vmatmul.mubr.f32.vlgmr.msra.gmra.mrb[6].mxu0 %v2041_v21  ;;  %3437 = vmatmul.mubr.f32.vlgmr.msra.gmra.mrb[6].mxu1 %v2041_v21 }
  0xbc   :  { %2989 = vmatpush1.msra.mxu0 %v8291_v6  ;;  %3454 = vmatpush1.msra.mxu1 %v8293_v7 }
  0xbd   :  { %3052 = vmatprep.mubr.f32.mxu0 %v7986_v1  ;;  %3062 = vmatprep.subr.mxu0 %v8225_v53 }
  0xbe   :  { %3517 = vmatprep.mubr.f32.mxu1 %v7986_v1  ;;  %3527 = vmatprep.subr.mxu1 %v8237_v56 }
  0xc3   :  { %3054 = vmatmul.mubr.f32.vlgmr.msra.gmra.mrb[6].mxu0 %v8335_v11  ;;  %3519 = vmatmul.mubr.f32.vlgmr.msra.gmra.mrb[6].mxu1 %v8335_v11 }
  0xc4   :  { %3065 = vmatpush1.msra.mxu0 %v8239_v57  ;;  %3530 = vmatpush1.msra.mxu1 %v8241_v58 }
  0xc5   :  { %3128 = vmatprep.mubr.f32.mxu0 %v7986_v1  ;;  %7674 = vmatprep.subr.msk.mxu0 %vm8193_vm3, %v7987_v12 }
  0xc6   :  { %3593 = vmatprep.mubr.f32.mxu1 %v7986_v1  ;;  %7680 = vmatprep.subr.msk.mxu1 %vm8199_vm7, %v7987_v12 }
  0xcb   :  { %3131 = vmatmul.mubr.f32.vlgmr.msra.gmra.mrb[6].mxu0 %v8348_v14  ;;  %3596 = vmatmul.mubr.f32.vlgmr.msra.gmra.mrb[6].mxu1 %v8348_v14 }
  0xcc   :  { %7675 = vmatpush1.msk.msra.mxu0 %vm8203_vm8, %v7987_v12  ;;  %7681 = vmatpush1.msk.msra.mxu1 %vm8207_vm10, %v7987_v12 }
  0xcd   :  { %3203 = vmatprep.mubr.f32.mxu0 %v7986_v1  ;;  %3216 = vmatprep.subr.mxu0 %v8244_v59 }
  0xce   :  { %3668 = vmatprep.mubr.f32.mxu1 %v7986_v1  ;;  %3681 = vmatprep.subr.mxu1 %v8247_v60 }
  0xd3   :  { %3207 = vmatmul.mubr.f32.vlgmr.msra.gmra.mrb[6].mxu0 %v8353_v17  ;;  %3672 = vmatmul.mubr.f32.vlgmr.msra.gmra.mrb[6].mxu1 %v8353_v17 }
  0xd4   :  { %3220 = vmatpush1.msra.mxu0 %v8258_v61  ;;  %3685 = vmatpush1.msra.mxu1 %v8261_v62 }
  0xd5   :  { %3283 = vmatprep.mubr.f32.mxu0 %v7986_v1  ;;  %7676 = vmatprep.subr.msk.mxu0 %vm8193_vm3, %v7987_v12 }
  0xd6   :  { %3748 = vmatprep.mubr.f32.mxu1 %v7986_v1  ;;  %7682 = vmatprep.subr.msk.mxu1 %vm8199_vm7, %v7987_v12 }
  0xdb   :  { %3285 = vmatmul.mubr.f32.vlgmr.msra.gmra.mrb[6].mxu0 %v8335_v11  ;;  %3750 = vmatmul.mubr.f32.vlgmr.msra.gmra.mrb[6].mxu1 %v8335_v11 }
  0xdc   :  { %7677 = vmatpush1.msk.msra.mxu0 %vm8203_vm8, %v7987_v12  ;;  %7683 = vmatpush1.msk.msra.mxu1 %vm8207_vm10, %v7987_v12 }
  0xdd   :  { %3357 = vmatprep.mubr.f32.mxu0 %v7986_v1  ;;  %3822 = vmatprep.mubr.f32.mxu1 %v7986_v1 }
  0xde   :  { %7684 = vmatprep.subr.msk.mxu0 %vm8055_vm6, %v7987_v12  ;;  %7690 = vmatprep.subr.msk.mxu1 %vm8064_vm9, %v7987_v12 }
  0xe3   :  { %3359 = vmatmul.mubr.f32.vlgmr.msra.gmra.mrb[6].mxu0 %v8335_v11  ;;  %3824 = vmatmul.mubr.f32.vlgmr.msra.gmra.mrb[6].mxu1 %v8335_v11 }
  0xe4   :  { %7685 = vmatpush1.msk.msra.mxu0 %vm8074_vm11, %v7987_v12  ;;  %7691 = vmatpush1.msk.msra.mxu1 %vm8088_vm12, %v7987_v12 }
  0xe5   :  { %3899 = vmatprep.mubr.f32.mxu0 %v7986_v1  ;;  %3916 = vmatprep.subr.mxu0 %v8127_v33 }
  0xe6   :  { %4364 = vmatprep.mubr.f32.mxu1 %v7986_v1  ;;  %4381 = vmatprep.subr.mxu1 %v8134_v36 }
  0xe7   :  { %3905 = vmatmul.mubr.f32.vlgmr.msra.gmra.mrb[8].mxu0 %v3904_v42  ;;  %4370 = vmatmul.mubr.f32.vlgmr.msra.gmra.mrb[8].mxu1 %v3904_v42 }
  0xe8   :  { %3922 = vmatpush1.msra.mxu0 %v8145_v40  ;;  %4387 = vmatpush1.msra.mxu1 %v8147_v41 }
  0xe9   :  { %3985 = vmatprep.mubr.f32.mxu0 %v7986_v1  ;;  %3995 = vmatprep.subr.mxu0 %v8078_v16 }
  0xea   :  { %4450 = vmatprep.mubr.f32.mxu1 %v7986_v1  ;;  %4460 = vmatprep.subr.mxu1 %v8092_v20 }
  0xef   :  { %3987 = vmatmul.mubr.f32.vlgmr.msra.gmra.mrb[8].mxu0 %v8491_v34  ;;  %4452 = vmatmul.mubr.f32.vlgmr.msra.gmra.mrb[8].mxu1 %v8491_v34 }
  0xf0   :  { %3998 = vmatpush1.msra.mxu0 %v8105_v24  ;;  %4463 = vmatpush1.msra.mxu1 %v8120_v30 }
  0xf1   :  { %4061 = vmatprep.mubr.f32.mxu0 %v7986_v1  ;;  %7686 = vmatprep.subr.msk.mxu0 %vm8055_vm6, %v7987_v12 }
  0xf2   :  { %4526 = vmatprep.mubr.f32.mxu1 %v7986_v1  ;;  %7692 = vmatprep.subr.msk.mxu1 %vm8064_vm9, %v7987_v12 }
  0xf7   :  { %4064 = vmatmul.mubr.f32.vlgmr.msra.gmra.mrb[8].mxu0 %v8504_v37  ;;  %4529 = vmatmul.mubr.f32.vlgmr.msra.gmra.mrb[8].mxu1 %v8504_v37 }
  0xf8   :  { %7687 = vmatpush1.msk.msra.mxu0 %vm8074_vm11, %v7987_v12  ;;  %7693 = vmatpush1.msk.msra.mxu1 %vm8088_vm12, %v7987_v12 }
  0xf9   :  { %4136 = vmatprep.mubr.f32.mxu0 %v7986_v1  ;;  %4149 = vmatprep.subr.mxu0 %v8101_v22 }
  0xfa   :  { %4601 = vmatprep.mubr.f32.mxu1 %v7986_v1  ;;  %4614 = vmatprep.subr.mxu1 %v8108_v25 }
  0xff   :  { %4140 = vmatmul.mubr.f32.vlgmr.msra.gmra.mrb[8].mxu0 %v8509_v38  ;;  %4605 = vmatmul.mubr.f32.vlgmr.msra.gmra.mrb[8].mxu1 %v8509_v38 }
 0x100   :  { %4153 = vmatpush1.msra.mxu0 %v8118_v29  ;;  %4618 = vmatpush1.msra.mxu1 %v8132_v35 }
 0x101   :  { %4216 = vmatprep.mubr.f32.mxu0 %v7986_v1  ;;  %7688 = vmatprep.subr.msk.mxu0 %vm8055_vm6, %v7987_v12 }
 0x102   :  { %4681 = vmatprep.mubr.f32.mxu1 %v7986_v1  ;;  %7694 = vmatprep.subr.msk.mxu1 %vm8064_vm9, %v7987_v12 }
 0x107   :  { %4218 = vmatmul.mubr.f32.vlgmr.msra.gmra.mrb[8].mxu0 %v8491_v34  ;;  %4683 = vmatmul.mubr.f32.vlgmr.msra.gmra.mrb[8].mxu1 %v8491_v34 }
 0x108   :  { %7689 = vmatpush1.msk.msra.mxu0 %vm8074_vm11, %v7987_v12  ;;  %7695 = vmatpush1.msk.msra.mxu1 %vm8088_vm12, %v7987_v12 }
 0x109   :  { %4290 = vmatprep.mubr.f32.mxu0 %v7986_v1  ;;  %4755 = vmatprep.mubr.f32.mxu1 %v7986_v1 }
 0x10a   :  { %7696 = vmatprep.subr.msk.mxu0 %vm8193_vm3, %v7987_v12  ;;  %7702 = vmatprep.subr.msk.mxu1 %vm8199_vm7, %v7987_v12 }
 0x10f   :  { %4292 = vmatmul.mubr.f32.vlgmr.msra.gmra.mrb[8].mxu0 %v8491_v34  ;;  %4757 = vmatmul.mubr.f32.vlgmr.msra.gmra.mrb[8].mxu1 %v8491_v34 }
 0x110   :  { %7697 = vmatpush1.msk.msra.mxu0 %vm8203_vm8, %v7987_v12  ;;  %7703 = vmatpush1.msk.msra.mxu1 %vm8207_vm10, %v7987_v12 }
 0x111   :  { %4829 = vmatprep.mubr.f32.mxu0 %v7986_v1  ;;  %4846 = vmatprep.subr.mxu0 %v8279_v4 }
 0x112   :  { %5294 = vmatprep.mubr.f32.mxu1 %v7986_v1  ;;  %5311 = vmatprep.subr.mxu1 %v8281_v5 }
 0x113   :  { %4835 = vmatmul.mubr.f32.vlgmr.msra.gmra.mrb[10].mxu0 %v3904_v42  ;;  %5300 = vmatmul.mubr.f32.vlgmr.msra.gmra.mrb[10].mxu1 %v3904_v42 }
 0x114   :  { %4852 = vmatpush1.msra.mxu0 %v8291_v6  ;;  %5317 = vmatpush1.msra.mxu1 %v8293_v7 }
 0x115   :  { %4915 = vmatprep.mubr.f32.mxu0 %v7986_v1  ;;  %4925 = vmatprep.subr.mxu0 %v8225_v53 }
 0x116   :  { %5380 = vmatprep.mubr.f32.mxu1 %v7986_v1  ;;  %5390 = vmatprep.subr.mxu1 %v8237_v56 }
 0x11b   :  { %4917 = vmatmul.mubr.f32.vlgmr.msra.gmra.mrb[10].mxu0 %v8491_v34  ;;  %5382 = vmatmul.mubr.f32.vlgmr.msra.gmra.mrb[10].mxu1 %v8491_v34 }
 0x11c   :  { %4928 = vmatpush1.msra.mxu0 %v8239_v57  ;;  %5393 = vmatpush1.msra.mxu1 %v8241_v58 }
 0x11d   :  { %4991 = vmatprep.mubr.f32.mxu0 %v7986_v1  ;;  %7698 = vmatprep.subr.msk.mxu0 %vm8193_vm3, %v7987_v12 }
 0x11e   :  { %5456 = vmatprep.mubr.f32.mxu1 %v7986_v1  ;;  %7704 = vmatprep.subr.msk.mxu1 %vm8199_vm7, %v7987_v12 }
 0x123   :  { %4994 = vmatmul.mubr.f32.vlgmr.msra.gmra.mrb[10].mxu0 %v8504_v37  ;;  %5459 = vmatmul.mubr.f32.vlgmr.msra.gmra.mrb[10].mxu1 %v8504_v37 }
 0x124   :  { %7699 = vmatpush1.msk.msra.mxu0 %vm8203_vm8, %v7987_v12  ;;  %7705 = vmatpush1.msk.msra.mxu1 %vm8207_vm10, %v7987_v12 }
 0x125   :  { %5066 = vmatprep.mubr.f32.mxu0 %v7986_v1  ;;  %5079 = vmatprep.subr.mxu0 %v8244_v59 }
 0x126   :  { %5531 = vmatprep.mubr.f32.mxu1 %v7986_v1  ;;  %5544 = vmatprep.subr.mxu1 %v8247_v60 }
 0x12b   :  { %5070 = vmatmul.mubr.f32.vlgmr.msra.gmra.mrb[10].mxu0 %v8509_v38  ;;  %5535 = vmatmul.mubr.f32.vlgmr.msra.gmra.mrb[10].mxu1 %v8509_v38 }
 0x12c   :  { %5083 = vmatpush1.msra.mxu0 %v8258_v61  ;;  %5548 = vmatpush1.msra.mxu1 %v8261_v62 }
 0x12d   :  { %5146 = vmatprep.mubr.f32.mxu0 %v7986_v1  ;;  %7700 = vmatprep.subr.msk.mxu0 %vm8193_vm3, %v7987_v12 }
 0x12e   :  { %5611 = vmatprep.mubr.f32.mxu1 %v7986_v1  ;;  %7706 = vmatprep.subr.msk.mxu1 %vm8199_vm7, %v7987_v12 }
 0x132   :  { %v8659_v51 = vpop.f32.mrb[0].mxu0  ;;  %v8661_v52 = vpop.f32.mrb[0].mxu1 }
 0x133   :  { %v8663_v54 = vpop.f32.mrb[1].mxu0  ;;  %v8665_v55 = vpop.f32.mrb[1].mxu1  ;;  %5148 = vmatmul.mubr.f32.vlgmr.msra.gmra.mrb[10].mxu0 %v8491_v34  ;;  %5613 = vmatmul.mubr.f32.vlgmr.msra.gmra.mrb[10].mxu1 %v8491_v34 }
 0x134   :  { %7701 = vmatpush1.msk.msra.mxu0 %vm8203_vm8, %v7987_v12  ;;  %7707 = vmatpush1.msk.msra.mxu1 %vm8207_vm10, %v7987_v12 }
 0x135   :  { %5220 = vmatprep.mubr.f32.mxu0 %v7986_v1  ;;  %5685 = vmatprep.mubr.f32.mxu1 %v7986_v1 }
 0x136   :  { %7708 = vmatprep.subr.msk.mxu0 %vm8055_vm6, %v7987_v12  ;;  %7714 = vmatprep.subr.msk.mxu1 %vm8064_vm9, %v7987_v12 }
 0x13b   :  { %5222 = vmatmul.mubr.f32.vlgmr.msra.gmra.mrb[10].mxu0 %v8491_v34  ;;  %5687 = vmatmul.mubr.f32.vlgmr.msra.gmra.mrb[10].mxu1 %v8491_v34 }
 0x13c   :  { %7709 = vmatpush1.msk.msra.mxu0 %vm8074_vm11, %v7987_v12  ;;  %7715 = vmatpush1.msk.msra.mxu1 %vm8088_vm12, %v7987_v12 }
 0x13d   :  { %5762 = vmatprep.mubr.f32.mxu0 %v7986_v1  ;;  %5779 = vmatprep.subr.mxu0 %v8127_v33 }
 0x13e   :  { %6227 = vmatprep.mubr.f32.mxu1 %v7986_v1  ;;  %6244 = vmatprep.subr.mxu1 %v8134_v36  ;;  %v7558_v36 = vld [vmem:[#allocation2 + $0x10] sm:$0xff] }
 0x13f   :  { %5768 = vmatmul.mubr.f32.vlgmr.msra.gmra.mrb[12].mxu0 %v5767_v2  ;;  %6233 = vmatmul.mubr.f32.vlgmr.msra.gmra.mrb[12].mxu1 %v5767_v2 }
 0x140   :  { %5785 = vmatpush1.msra.mxu0 %v8145_v40  ;;  %6250 = vmatpush1.msra.mxu1 %v8147_v41  ;;  %v7557_v40 = vld [vmem:[#allocation2 + $0x8] sm:$0xff]  ;;  %v7559_v41 = vld [vmem:[#allocation2 + $0x18] sm:$0xff] }
 0x141   :  { %5848 = vmatprep.mubr.f32.mxu0 %v7986_v1  ;;  %5858 = vmatprep.subr.mxu0 %v8078_v16 }
 0x142   :  { %6313 = vmatprep.mubr.f32.mxu1 %v7986_v1  ;;  %6323 = vmatprep.subr.mxu1 %v8092_v20 }
 0x147   :  { %5850 = vmatmul.mubr.f32.vlgmr.msra.gmra.mrb[12].mxu0 %v8644_v45  ;;  %6315 = vmatmul.mubr.f32.vlgmr.msra.gmra.mrb[12].mxu1 %v8644_v45 }
 0x148   :  { %5861 = vmatpush1.msra.mxu0 %v8105_v24  ;;  %6326 = vmatpush1.msra.mxu1 %v8120_v30 }
 0x149   :  { %5924 = vmatprep.mubr.f32.mxu0 %v7986_v1  ;;  %7710 = vmatprep.subr.msk.mxu0 %vm8055_vm6, %v7987_v12 }
 0x14a   :  { %6389 = vmatprep.mubr.f32.mxu1 %v7986_v1  ;;  %7716 = vmatprep.subr.msk.mxu1 %vm8064_vm9, %v7987_v12 }
 0x14f   :  { %5927 = vmatmul.mubr.f32.vlgmr.msra.gmra.mrb[12].mxu0 %v8657_v46  ;;  %6392 = vmatmul.mubr.f32.vlgmr.msra.gmra.mrb[12].mxu1 %v8657_v46 }
 0x150   :  { %7711 = vmatpush1.msk.msra.mxu0 %vm8074_vm11, %v7987_v12  ;;  %7717 = vmatpush1.msk.msra.mxu1 %vm8088_vm12, %v7987_v12 }
 0x151   :  { %5999 = vmatprep.mubr.f32.mxu0 %v7986_v1  ;;  %6012 = vmatprep.subr.mxu0 %v8101_v22 }
 0x152   :  { %6464 = vmatprep.mubr.f32.mxu1 %v7986_v1  ;;  %6477 = vmatprep.subr.mxu1 %v8108_v25 }
 0x157   :  { %6003 = vmatmul.mubr.f32.vlgmr.msra.gmra.mrb[12].mxu0 %v8670_v63  ;;  %6468 = vmatmul.mubr.f32.vlgmr.msra.gmra.mrb[12].mxu1 %v8670_v63 }
 0x158   :  { %6016 = vmatpush1.msra.mxu0 %v8118_v29  ;;  %6481 = vmatpush1.msra.mxu1 %v8132_v35  ;;  %v7556_v35 = vld [vmem:[#allocation2] sm:$0xff] }
 0x159   :  { %6079 = vmatprep.mubr.f32.mxu0 %v7986_v1  ;;  %7712 = vmatprep.subr.msk.mxu0 %vm8055_vm6, %v7987_v12 }
 0x15a   :  { %6544 = vmatprep.mubr.f32.mxu1 %v7986_v1  ;;  %7718 = vmatprep.subr.msk.mxu1 %vm8064_vm9, %v7987_v12 }
 0x15e   :  { %v8742_v16 = vpop.f32.mrb[2].mxu0  ;;  %v8744_v20 = vpop.f32.mrb[2].mxu1 }
 0x15f   :  { %v8746_v22 = vpop.f32.mrb[3].mxu0  ;;  %v8748_v24 = vpop.f32.mrb[3].mxu1  ;;  %6081 = vmatmul.mubr.f32.vlgmr.msra.gmra.mrb[12].mxu0 %v8644_v45  ;;  %6546 = vmatmul.mubr.f32.vlgmr.msra.gmra.mrb[12].mxu1 %v8644_v45 }
 0x160   :  { %7713 = vmatpush1.msk.msra.mxu0 %vm8074_vm11, %v7987_v12  ;;  %7719 = vmatpush1.msk.msra.mxu1 %vm8088_vm12, %v7987_v12 }
 0x161   :  { %6153 = vmatprep.mubr.f32.mxu0 %v7986_v1  ;;  %6618 = vmatprep.mubr.f32.mxu1 %v7986_v1 }
 0x162   :  { %7720 = vmatprep.subr.msk.mxu0 %vm8193_vm3, %v7987_v12  ;;  %7726 = vmatprep.subr.msk.mxu1 %vm8199_vm7, %v7987_v12 }
 0x167   :  { %6155 = vmatmul.mubr.f32.vlgmr.msra.gmra.mrb[12].mxu0 %v8644_v45  ;;  %6620 = vmatmul.mubr.f32.vlgmr.msra.gmra.mrb[12].mxu1 %v8644_v45 }
 0x168   :  { %7721 = vmatpush1.msk.msra.mxu0 %vm8203_vm8, %v7987_v12  ;;  %7727 = vmatpush1.msk.msra.mxu1 %vm8207_vm10, %v7987_v12 }
 0x169   :  { %6692 = vmatprep.mubr.f32.mxu0 %v7986_v1  ;;  %6709 = vmatprep.subr.mxu0 %v8279_v4 }
 0x16a   :  { %7157 = vmatprep.mubr.f32.mxu1 %v7986_v1  ;;  %7174 = vmatprep.subr.mxu1 %v8281_v5  ;;  %v7560_v5 = vld [vmem:[#allocation2 + $0x20] sm:$0xff] }
 0x16b   :  { %6698 = vmatmul.mubr.f32.vlgmr.msra.gmra.mrb[14].mxu0 %v5767_v2  ;;  %7163 = vmatmul.mubr.f32.vlgmr.msra.gmra.mrb[14].mxu1 %v5767_v2 }
 0x16c   :  { %6715 = vmatpush1.msra.mxu0 %v8291_v6  ;;  %7180 = vmatpush1.msra.mxu1 %v8293_v7  ;;  %v7562_v6 = vld [vmem:[#allocation2 + $0x30] sm:$0xff]  ;;  %v7561_v7 = vld [vmem:[#allocation2 + $0x28] sm:$0xff] }
 0x16d   :  { %6778 = vmatprep.mubr.f32.mxu0 %v7986_v1  ;;  %6788 = vmatprep.subr.mxu0 %v8225_v53 }
 0x16e   :  { %7243 = vmatprep.mubr.f32.mxu1 %v7986_v1  ;;  %7253 = vmatprep.subr.mxu1 %v8237_v56 }
 0x173   :  { %6780 = vmatmul.mubr.f32.vlgmr.msra.gmra.mrb[14].mxu0 %v8644_v45  ;;  %7245 = vmatmul.mubr.f32.vlgmr.msra.gmra.mrb[14].mxu1 %v8644_v45 }
 0x174   :  { %6791 = vmatpush1.msra.mxu0 %v8239_v57  ;;  %7256 = vmatpush1.msra.mxu1 %v8241_v58 }
 0x175   :  { %6854 = vmatprep.mubr.f32.mxu0 %v7986_v1  ;;  %7722 = vmatprep.subr.msk.mxu0 %vm8193_vm3, %v7987_v12 }
 0x176   :  { %7319 = vmatprep.mubr.f32.mxu1 %v7986_v1  ;;  %7728 = vmatprep.subr.msk.mxu1 %vm8199_vm7, %v7987_v12 }
 0x17b   :  { %6857 = vmatmul.mubr.f32.vlgmr.msra.gmra.mrb[14].mxu0 %v8657_v46  ;;  %7322 = vmatmul.mubr.f32.vlgmr.msra.gmra.mrb[14].mxu1 %v8657_v46 }
 0x17c   :  { %7723 = vmatpush1.msk.msra.mxu0 %vm8203_vm8, %v7987_v12  ;;  %7729 = vmatpush1.msk.msra.mxu1 %vm8207_vm10, %v7987_v12 }
 0x17d   :  { %6929 = vmatprep.mubr.f32.mxu0 %v7986_v1  ;;  %6942 = vmatprep.subr.mxu0 %v8244_v59 }
 0x17e   :  { %7394 = vmatprep.mubr.f32.mxu1 %v7986_v1  ;;  %7407 = vmatprep.subr.mxu1 %v8247_v60 }
 0x183   :  { %6933 = vmatmul.mubr.f32.vlgmr.msra.gmra.mrb[14].mxu0 %v8670_v63  ;;  %7398 = vmatmul.mubr.f32.vlgmr.msra.gmra.mrb[14].mxu1 %v8670_v63 }
 0x184   :  { %6946 = vmatpush1.msra.mxu0 %v8258_v61  ;;  %7411 = vmatpush1.msra.mxu1 %v8261_v62 }
 0x185   :  { %7009 = vmatprep.mubr.f32.mxu0 %v7986_v1  ;;  %7724 = vmatprep.subr.msk.mxu0 %vm8193_vm3, %v7987_v12 }
 0x186   :  { %7474 = vmatprep.mubr.f32.mxu1 %v7986_v1  ;;  %7730 = vmatprep.subr.msk.mxu1 %vm8199_vm7, %v7987_v12 }
 0x18a   :  { %v2430_v10 = vpop.f32.mrb[4].mxu0  ;;  %v2895_v13 = vpop.f32.mrb[4].mxu1 }
 0x18b   :  { %v2432_v15 = vpop.f32.mrb[5].mxu0  ;;  %v2897_v19 = vpop.f32.mrb[5].mxu1  ;;  %7011 = vmatmul.mubr.f32.vlgmr.msra.gmra.mrb[14].mxu0 %v8644_v45  ;;  %7476 = vmatmul.mubr.f32.vlgmr.msra.gmra.mrb[14].mxu1 %v8644_v45  ;;  %v7564_v47 = vmul.f32 %v7556_v35, %v2430_v10  ;;  %v7566_v48 = vmul.f32 %v7558_v36, %v2895_v13 }
 0x18c   :  { %7725 = vmatpush1.msk.msra.mxu0 %vm8203_vm8, %v7987_v12  ;;  %7731 = vmatpush1.msk.msra.mxu1 %vm8207_vm10, %v7987_v12  ;;  %v7565_v49 = vmul.f32 %v7557_v40, %v2432_v15  ;;  %v7567_v12 = vmul.f32 %v7559_v41, %v2897_v19 }
 0x18d   :  { %7083 = vmatprep.mubr.f32.mxu0 %v7986_v1  ;;  %7548 = vmatprep.mubr.f32.mxu1 %v7986_v1  ;;  %v7893_v50 = vround.rtne.f32 %v7564_v47  ;;  %v7895_v53 = vround.rtne.f32 %v7566_v48 }
 0x18e   :  { %v7894_v56 = vround.rtne.f32 %v7565_v49  ;;  %v7896_v1 = vround.rtne.f32 %v7567_v12 }
 0x193   :  { %7085 = vmatmul.mubr.f32.vlgmr.msra.gmra.mrb[14].mxu0 %v8644_v45  ;;  %7550 = vmatmul.mubr.f32.vlgmr.msra.gmra.mrb[14].mxu1 %v8644_v45 }
 0x1b6   :  { %v3360_v25 = vpop.f32.mrb[6].mxu0  ;;  %v3825_v29 = vpop.f32.mrb[6].mxu1 }
 0x1b7   :  { %v3362_v30 = vpop.f32.mrb[7].mxu0  ;;  %v3827_v33 = vpop.f32.mrb[7].mxu1  ;;  %v7568_v9 = vmul.f32 %v7560_v5, %v3360_v25  ;;  %v7570_v11 = vmul.f32 %v7562_v6, %v3825_v29 }
 0x1b8   :  { %v7569_v14 = vmul.f32 %v7561_v7, %v3362_v30  ;;  %v7571_v17 = vmul.f32 %v7563_v8, %v3827_v33 }
 0x1b9   :  { %v7897_v18 = vround.rtne.f32 %v7568_v9  ;;  %v7899_v21 = vround.rtne.f32 %v7570_v11 }
 0x1ba   :  { %v7898_v23 = vround.rtne.f32 %v7569_v14  ;;  %v7900_v26 = vround.rtne.f32 %v7571_v17 }
 0x1e2   :  { %v4293_v57 = vpop.f32.mrb[8].mxu0  ;;  %v4758_v58 = vpop.f32.mrb[8].mxu1 }
 0x1e3   :  { %v7580_v59 = vmax.f32 %v4293_v57, %v7893_v50  ;;  %v7582_v60 = vmax.f32 %v4758_v58, %v7895_v53  ;;  %v4295_v61 = vpop.f32.mrb[9].mxu0  ;;  %v4760_v62 = vpop.f32.mrb[9].mxu1 }
 0x1e4   :  { %v7581_v3 = vmax.f32 %v4295_v61, %v7894_v56  ;;  %v7583_v4 = vmax.f32 %v4760_v62, %v7896_v1 }
 0x20e   :  { %v5223_v27 = vpop.f32.mrb[10].mxu0  ;;  %v5688_v28 = vpop.f32.mrb[10].mxu1 }
 0x20f   :  { %v7584_v31 = vmax.f32 %v5223_v27, %v7897_v18  ;;  %v7586_v32 = vmax.f32 %v5688_v28, %v7899_v21  ;;  %v5225_v34 = vpop.f32.mrb[11].mxu0  ;;  %v5690_v37 = vpop.f32.mrb[11].mxu1 }
 0x210   :  { %v7585_v38 = vmax.f32 %v5225_v34, %v7898_v23  ;;  %v7587_v39 = vmax.f32 %v5690_v37, %v7900_v26 }
 0x23a   :  { %v6156_v42 = vpop.f32.mrb[12].mxu0  ;;  %v6621_v43 = vpop.f32.mrb[12].mxu1 }
 0x23b   :  { %v7588_v44 = vmin.f32 %v6156_v42, %v7580_v59  ;;  %v7590_v45 = vmin.f32 %v6621_v43, %v7582_v60  ;;  %v6158_v46 = vpop.f32.mrb[13].mxu0  ;;  %v6623_v63 = vpop.f32.mrb[13].mxu1 }
 0x23c   :  { %v7589_v0 = vmin.f32 %v6158_v46, %v7581_v3  ;;  %v7591_v2 = vmin.f32 %v6623_v63, %v7583_v4 }
 0x23d   :  { %v7596_v10 = vmul.f32 %v7588_v44, %v8659_v51  ;;  %v7598_v13 = vmul.f32 %v7590_v45, %v8661_v52 }
 0x23e   :  { %v7597_v15 = vmul.f32 %v7589_v0, %v8663_v54  ;;  %v7599_v19 = vmul.f32 %v7591_v2, %v8665_v55 }
 0x23f   :  { %7604 = vst [vmem:[#allocation7] sm:$0xff] %v7596_v10  ;;  %7606 = vst [vmem:[#allocation7 + $0x10] sm:$0xff] %v7598_v13 }
 0x240   :  { %7605 = vst [vmem:[#allocation7 + $0x8] sm:$0xff] %v7597_v15  ;;  %7607 = vst [vmem:[#allocation7 + $0x18] sm:$0xff] %v7599_v19 }
 0x266   :  { %v7086_v25 = vpop.f32.mrb[14].mxu0  ;;  %v7551_v29 = vpop.f32.mrb[14].mxu1 }
 0x267   :  { %v7592_v30 = vmin.f32 %v7086_v25, %v7584_v31  ;;  %v7594_v33 = vmin.f32 %v7551_v29, %v7586_v32  ;;  %v7088_v35 = vpop.f32.mrb[15].mxu0  ;;  %v7553_v36 = vpop.f32.mrb[15].mxu1 }
 0x268   :  { %v7593_v40 = vmin.f32 %v7088_v35, %v7585_v38  ;;  %v7595_v51 = vmin.f32 %v7553_v36, %v7587_v39 }
 0x269   :  { %v7600_v52 = vmul.f32 %v7592_v30, %v8742_v16  ;;  %v7602_v54 = vmul.f32 %v7594_v33, %v8744_v20 }
 0x26a   :  { %v7601_v55 = vmul.f32 %v7593_v40, %v8746_v22  ;;  %v7603_v41 = vmul.f32 %v7595_v51, %v8748_v24 }
 0x26b   :  { %7608 = vst [vmem:[#allocation7 + $0x20] sm:$0xff] %v7600_v52  ;;  %7610 = vst [vmem:[#allocation7 + $0x30] sm:$0xff] %v7602_v54 }
 0x26c   :  { %7609 = vst [vmem:[#allocation7 + $0x28] sm:$0xff] %v7601_v55  ;;  %7611 = vst [vmem:[#allocation7 + $0x38] sm:$0xff] %v7603_v41 }
 0x26d   :  { %7965 = shalt.err (!%p7962_p6)
}
 0x26e   :  { %s7966_s10 = scalar_lea.hbm %s8854_s2, 1024 }
 0x26f   :  { %p7967_p7 = scmp.ne.s32.totalorder %s8854_s2, %s7966_s10  ;;  %p7970_p8 = scmp.lt.u32.totalorder %s7966_s10, %s8854_s2 }
 0x271   :  { %p7972_p9 = pnand %p7970_p8, %p7967_p7 }
 0x273   :  { %7975 = shalt.err (!%p7972_p9)
}
 0x274   :  { %7621 = dma.vmem_to_hbm [thread:$0]  %s7619_s6, 1024, %s8854_s2, [#allocation4]  }
 0x275   :  { %7980 = dma.done.wait [#allocation4], 1024  }
 0x276   :  { %7981 = vsyncadd [#allocation4], 4294966272 }
 0x277   :  { %7625 = vsyncpa [#allocation3], 1 }
 0x278   :  { %7626 = vsyncpa [#allocation6], 1 }
 0x279   :  { %7627 = vsyncpa [#allocation4], 1 }

</bundles_post_ra>
